<compile_context>
chip_gen: v7x
topology: tpu7x:2x2x1
jax: 0.10.0
libtpu: 0.0.40
codegen_flags: <defaults>
</compile_context>

<pallas_src>
import jax
import jax.numpy as jnp
from jax import lax
from jax.experimental import pallas as pl
from jax.experimental.pallas import tpu as pltpu


# ----------------------------------------------------------------------------
# helpers
# ----------------------------------------------------------------------------
def _round_up(n, m):
    return ((n + m - 1) // m) * m


def _largest_divisor_leq(n, cap):
    for d in range(min(n, cap), 0, -1):
        if n % d == 0:
            return d
    return 1


# ----------------------------------------------------------------------------
# Kernel 1: 3x3 conv + folded BatchNorm + ReLU, in-kernel im2col over W.
# Grid = (H,). The padded input is passed three times with row offsets 0/1/2
# (halo rows); the 3 horizontal taps are VMEM slices inside the kernel.
# ----------------------------------------------------------------------------
def _conv3x3_kernel(r0_ref, r1_ref, r2_ref, w_ref, s_ref, b_ref, o_ref):
    B = o_ref.shape[0]
    W = o_ref.shape[2]
    rows = (r0_ref, r1_ref, r2_ref)
    for b in range(B):                      # B is small & static: unrolled
        acc = None
        for dy in range(3):
            for dx in range(3):
                lhs = rows[dy][b, 0, dx:dx + W, :]          # (W, Cin) bf16
                t = jnp.dot(lhs, w_ref[3 * dy + dx],
                            preferred_element_type=jnp.float32)
                acc = t if acc is None else acc + t
        y = acc * s_ref[...] + b_ref[...]   # folded conv-bias + BN (eval)
        o_ref[b, 0] = jnp.maximum(y, 0.0).astype(o_ref.dtype)


def conv3x3_bn_relu(x_nhwc, w, conv_b, gamma, beta, mean, var, eps=1e-5):
    """Conv2d(3,1,1,bias) + BatchNorm2d(eval) + ReLU; bf16 compute, f32 acc."""
    B, H, W, Cin = x_nhwc.shape
    Cout = w.shape[-1]

    scale = (gamma / jnp.sqrt(var + eps)).astype(jnp.float32)
    bias = ((conv_b - mean) * scale + beta).astype(jnp.float32)

    w9 = w.reshape(9, Cin, Cout)
    cin_p = max(Cin, 8)                      # pad tiny channel counts (zeros)
    if cin_p != Cin:
        x_nhwc = jnp.pad(x_nhwc, ((0, 0), (0, 0), (0, 0), (0, cin_p - Cin)))
        w9 = jnp.pad(w9, ((0, 0), (0, cin_p - Cin), (0, 0)))

    xp = jnp.pad(x_nhwc, ((0, 0), (1, 1), (1, 1), (0, 0))).astype(jnp.bfloat16)
    w9 = w9.astype(jnp.bfloat16)

    row_spec = lambda off: pl.BlockSpec((B, 1, W + 2, cin_p),
                                        lambda h, o=off: (0, h + o, 0, 0))
    return pl.pallas_call(
        _conv3x3_kernel,
        out_shape=jax.ShapeDtypeStruct((B, H, W, Cout), jnp.bfloat16),
        grid_spec=pltpu.PrefetchScalarGridSpec(
            num_scalar_prefetch=0,
            grid=(H,),
            in_specs=[row_spec(0), row_spec(1), row_spec(2),
                      pl.BlockSpec((9, cin_p, Cout), lambda h: (0, 0, 0)),
                      pl.BlockSpec((1, Cout), lambda h: (0, 0)),
                      pl.BlockSpec((1, Cout), lambda h: (0, 0))],
            out_specs=pl.BlockSpec((B, 1, W, Cout), lambda h: (0, h, 0, 0))),
        compiler_params=pltpu.CompilerParams(dimension_semantics=("parallel",)),
    )(xp, xp, xp, w9, scale.reshape(1, Cout), bias.reshape(1, Cout))


# ----------------------------------------------------------------------------
# Kernel 2: MaxPool2d(2, 2) over a (B, H2, 2, W2, 2, C) view, tiled over rows.
# ----------------------------------------------------------------------------
def _maxpool_kernel(x_ref, o_ref):
    x = x_ref[0]                             # (TH, 2, W2, 2, C)
    m = jnp.maximum(x[:, 0], x[:, 1])        # max over row pair  -> (TH, W2, 2, C)
    o_ref[0] = jnp.max(m, axis=2)            # max over col pair  -> (TH, W2, C)


def maxpool2x2(x):
    B, H, W, C = x.shape
    H2, W2 = H // 2, W // 2                  # floor, like nn.MaxPool2d(2,2)
    x = x[:, :2 * H2, :2 * W2, :]
    x6 = x.reshape(B, H2, 2, W2, 2, C)
    th = _largest_divisor_leq(H2, 8)
    return pl.pallas_call(
        _maxpool_kernel,
        out_shape=jax.ShapeDtypeStruct((B, H2, W2, C), x.dtype),
        grid_spec=pltpu.PrefetchScalarGridSpec(
            num_scalar_prefetch=0,
            grid=(B, H2 // th),
            in_specs=[pl.BlockSpec((1, th, 2, W2, 2, C),
                                   lambda b, i: (b, i, 0, 0, 0, 0))],
            out_specs=pl.BlockSpec((1, th, W2, C), lambda b, i: (b, i, 0, 0))),
        compiler_params=pltpu.CompilerParams(
            dimension_semantics=("parallel", "parallel")),
    )(x6)


# ----------------------------------------------------------------------------
# Kernel 3: F.max_pool2d(y, [H, 1]) == max over the full height axis
# ----------------------------------------------------------------------------
def _hmax_kernel(x_ref, o_ref):
    o_ref[0] = jnp.max(x_ref[0], axis=0)


def height_max(x):
    B, H, W, C = x.shape
    return pl.pallas_call(
        _hmax_kernel,
        out_shape=jax.ShapeDtypeStruct((B, W, C), x.dtype),
        grid_spec=pltpu.PrefetchScalarGridSpec(
            num_scalar_prefetch=0, grid=(B,),
            in_specs=[pl.BlockSpec((1, H, W, C), lambda b: (b, 0, 0, 0))],
            out_specs=pl.BlockSpec((1, W, C), lambda b: (b, 0, 0))),
        compiler_params=pltpu.CompilerParams(dimension_semantics=("parallel",)),
    )(x)


# ----------------------------------------------------------------------------
# Kernel 4: generic row-tiled matmul + bias (used for the hoisted LSTM input
# projection).  bf16 operands, f32 accumulation, lane-dense N.
# ----------------------------------------------------------------------------
def _mm_bias_kernel(x_ref, w_ref, b_ref, o_ref):
    y = jnp.dot(x_ref[...], w_ref[...],
                preferred_element_type=jnp.float32) + b_ref[...]
    o_ref[...] = y.astype(o_ref.dtype)


def matmul_bias(x2d, w, bias, out_dtype=jnp.float32, tm=512):
    M, K = x2d.shape
    N = w.shape[1]
    tm = min(tm, _round_up(M, 8))
    Mp = _round_up(M, tm)
    xpad = jnp.pad(x2d, ((0, Mp - M), (0, 0)))
    out = pl.pallas_call(
        _mm_bias_kernel,
        out_shape=jax.ShapeDtypeStruct((Mp, N), out_dtype),
        grid_spec=pltpu.PrefetchScalarGridSpec(
            num_scalar_prefetch=0, grid=(Mp // tm,),
            in_specs=[pl.BlockSpec((tm, K), lambda i: (i, 0)),
                      pl.BlockSpec((K, N), lambda i: (0, 0)),
                      pl.BlockSpec((1, N), lambda i: (0, 0))],
            out_specs=pl.BlockSpec((tm, N), lambda i: (i, 0))),
        compiler_params=pltpu.CompilerParams(dimension_semantics=("parallel",)),
    )(xpad, w, bias)
    return out[:M]


# ----------------------------------------------------------------------------
# Kernel 5: bidirectional LSTM recurrence.
#   grid = (direction=2 ["parallel"], time-chunk ["arbitrary"])
#   per step: in-kernel fori_loop over the chunk; one (B,H)x(H,4H) matmul per
#   time step; precomputed input gates are read from xg; h/c live in vregs and
#   are carried across chunks through VMEM scratch.
# ----------------------------------------------------------------------------
def _sigmoid(x):
    # EUP tanh instead of a VPU divide: sigmoid(x) = 0.5*tanh(x/2) + 0.5
    return 0.5 * jnp.tanh(0.5 * x) + 0.5


def _lstm_kernel(xg_ref, whh_ref, o_ref, h_sc, c_sc):
    d = pl.program_id(0)                     # 0 = forward, 1 = backward
    TC = o_ref.shape[1]
    H = o_ref.shape[3]

    @pl.when(pl.program_id(1) == 0)
    def _():
        h_sc[...] = jnp.zeros_like(h_sc)
        c_sc[...] = jnp.zeros_like(c_sc)

    whh = whh_ref[0]                         # (H, 4H) bf16

    def step(s, carry):
        h, cc = carry
        t = s + d * (TC - 1 - 2 * s)         # forward: s ; backward: TC-1-s
        g = xg_ref[0, t] + jnp.dot(h.astype(whh.dtype), whh,
                                   preferred_element_type=jnp.float32)
        i_g = _sigmoid(g[:, 0:H])
        f_g = _sigmoid(g[:, H:2 * H])
        g_g = jnp.tanh(g[:, 2 * H:3 * H])
        o_g = _sigmoid(g[:, 3 * H:4 * H])
        cc = f_g * cc + i_g * g_g
        h = o_g * jnp.tanh(cc)
        o_ref[0, t] = h
        return (h, cc)

    h_f, c_f = lax.fori_loop(0, TC, step, (h_sc[...], c_sc[...]), unroll=True)
    h_sc[...] = h_f
    c_sc[...] = c_f


def lstm_recurrent(xg, whh, hidden):
    """xg: (2, T, B, 4H) precomputed input gates; whh: (2, H, 4H) -> (2,T,B,H)."""
    _, T, B, G = xg.shape
    TC = _largest_divisor_leq(T, 32)
    nc = T // TC
    tmap = lambda d, c: (d, c + d * (nc - 1 - 2 * c), 0, 0)
    return pl.pallas_call(
        _lstm_kernel,
        out_shape=jax.ShapeDtypeStruct((2, T, B, hidden), jnp.float32),
        grid_spec=pltpu.PrefetchScalarGridSpec(
            num_scalar_prefetch=0,
            grid=(2, nc),
            in_specs=[pl.BlockSpec((1, TC, B, G), tmap),
                      pl.BlockSpec((1, hidden, G), lambda d, c: (d, 0, 0))],
            out_specs=pl.BlockSpec((1, TC, B, hidden), tmap),
            scratch_shapes=[pltpu.VMEM((B, hidden), jnp.float32),
                            pltpu.VMEM((B, hidden), jnp.float32)]),
        compiler_params=pltpu.CompilerParams(
            dimension_semantics=("parallel", "arbitrary")),
    )(xg, whh)


def bilstm_layer(x_tbf, lp, hidden):
    """x: (T, B, In) -> (T, B, 2*hidden).  Gate order (i, f, g, o)."""
    T, B, In = x_tbf.shape
    x2d = x_tbf.reshape(T * B, In).astype(jnp.bfloat16)
    gates = []
    for d in ('f', 'b'):
        g = matmul_bias(x2d, lp[d]['wih'].astype(jnp.bfloat16), lp[d]['bias'])
        gates.append(g.reshape(T, B, 4 * hidden))
    xg = jnp.stack(gates, axis=0)                                # (2,T,B,4H)
    whh = jnp.stack([lp['f']['whh'], lp['b']['whh']], axis=0).astype(jnp.bfloat16)
    out = lstm_recurrent(xg, whh, hidden)                        # (2,T,B,H)
    return jnp.concatenate([out[0], out[1]], axis=-1)            # (T,B,2H)


# ----------------------------------------------------------------------------
# Kernel 6: head  Linear(2h,512) -> ReLU -> Dropout(id) -> Linear(512,C)
# N padded to 128 (lane-dense stores), tiled over rows.
# ----------------------------------------------------------------------------
def _head_kernel(x_ref, w1_ref, b1_ref, w2_ref, b2_ref, o_ref):
    h = jnp.dot(x_ref[...], w1_ref[...],
                preferred_element_type=jnp.float32) + b1_ref[...]
    h = jnp.maximum(h, 0.0)
    # Dropout(0.5) is the identity in inference mode.
    o_ref[...] = jnp.dot(h.astype(w2_ref.dtype), w2_ref[...],
                         preferred_element_type=jnp.float32) + b2_ref[...]


def head(x2d, p, nclasses, tm=512):
    M, K = x2d.shape
    H1 = p['w1'].shape[1]
    Np = _round_up(nclasses, 128)
    w1 = p['w1'].astype(jnp.bfloat16)
    b1 = p['b1']
    w2 = jnp.pad(p['w2'], ((0, 0), (0, Np - nclasses))).astype(jnp.bfloat16)
    b2 = jnp.pad(p['b2'], ((0, 0), (0, Np - nclasses)))
    tm = min(tm, _round_up(M, 8))
    Mp = _round_up(M, tm)
    xb = jnp.pad(x2d.astype(jnp.bfloat16), ((0, Mp - M), (0, 0)))
    out = pl.pallas_call(
        _head_kernel,
        out_shape=jax.ShapeDtypeStruct((Mp, Np), jnp.float32),
        grid_spec=pltpu.PrefetchScalarGridSpec(
            num_scalar_prefetch=0, grid=(Mp // tm,),
            in_specs=[pl.BlockSpec((tm, K), lambda i: (i, 0)),
                      pl.BlockSpec((K, H1), lambda i: (0, 0)),
                      pl.BlockSpec((1, H1), lambda i: (0, 0)),
                      pl.BlockSpec((H1, Np), lambda i: (0, 0)),
                      pl.BlockSpec((1, Np), lambda i: (0, 0))],
            out_specs=pl.BlockSpec((tm, Np), lambda i: (i, 0))),
        compiler_params=pltpu.CompilerParams(dimension_semantics=("parallel",)),
    )(xb, w1, b1, w2, b2)
    return out[:M, :nclasses]


# ----------------------------------------------------------------------------
# Parameter construction (deterministic, synthetic)
# ----------------------------------------------------------------------------
def init_params(key, cnn_cfg, rnn_cfg, nclasses):
    hidden, num_layers = rnn_cfg
    keys = iter(jax.random.split(key, 128))
    nk = lambda: next(keys)

    feats = []
    in_c = 1
    for m in cnn_cfg:
        if m == 'M':
            feats.append({'type': 'M'})
        else:
            for _ in range(m[0]):
                out_c = m[1]
                feats.append({
                    'type': 'C',
                    # conv weight as (kh, kw, cin, cout)
                    'w': 0.2 * jax.random.normal(nk(), (3, 3, in_c, out_c), jnp.float32),
                    'b': 0.1 * jax.random.normal(nk(), (out_c,), jnp.float32),
                    'gamma': 1.0 + 0.1 * jax.random.normal(nk(), (out_c,), jnp.float32),
                    'beta': 0.1 * jax.random.normal(nk(), (out_c,), jnp.float32),
                    'mean': 0.1 * jax.random.normal(nk(), (out_c,), jnp.float32),
                    'var': 1.0 + 0.05 * jax.random.uniform(nk(), (out_c,), jnp.float32),
                })
                in_c = out_c

    rnn_in = cnn_cfg[-1][-1]
    lstm = []
    in_f = rnn_in
    for _ in range(num_layers):
        layer = {}
        for d in ('f', 'b'):   # forward / backward
            layer[d] = {
                # gates concatenated along N in order (i, f, g, o);
                # bias = b_ih + b_hh pre-combined.
                'wih': jax.random.normal(nk(), (in_f, 4 * hidden), jnp.float32)
                       / jnp.sqrt(float(in_f)),
                'whh': jax.random.normal(nk(), (hidden, 4 * hidden), jnp.float32)
                       / jnp.sqrt(float(hidden)),
                'bias': 0.1 * jax.random.normal(nk(), (1, 4 * hidden), jnp.float32),
            }
        lstm.append(layer)
        in_f = 2 * hidden

    fnl = {
        'w1': 0.05 * jax.random.normal(nk(), (2 * hidden, 512), jnp.float32),
        'b1': 0.05 * jax.random.normal(nk(), (1, 512), jnp.float32),
        'w2': 0.05 * jax.random.normal(nk(), (512, nclasses), jnp.float32),
        'b2': 0.05 * jax.random.normal(nk(), (1, nclasses), jnp.float32),
    }
    return {'features': feats, 'lstm': lstm, 'fnl': fnl,
            'hidden': hidden, 'nclasses': nclasses}


# ----------------------------------------------------------------------------
# Full forward pass (mirrors HTRNet.forward, eval mode)
# ----------------------------------------------------------------------------
def htrnet_forward(params, x_nchw):
    hidden = params['hidden']
    nclasses = params['nclasses']
    x = jnp.transpose(x_nchw, (0, 2, 3, 1)).astype(jnp.bfloat16)   # NCHW -> NHWC

    # self.features
    for layer in params['features']:
        if layer['type'] == 'M':
            x = maxpool2x2(x)
        else:
            x = conv3x3_bn_relu(x, layer['w'], layer['b'], layer['gamma'],
                                layer['beta'], layer['mean'], layer['var'])

    # F.max_pool2d(y, [H, 1]); permute(2,3,0,1)[0]  -> (T=W, B, C)
    y = height_max(x)                      # (B, W, C)
    y = jnp.transpose(y, (1, 0, 2))        # (T, B, C)

    # bidirectional LSTM stack
    for lp in params['lstm']:
        y = bilstm_layer(y, lp, hidden)    # (T, B, 2*hidden) f32

    # self.fnl
    T, B, F2 = y.shape
    logits = head(y.reshape(T * B, F2), params['fnl'], nclasses)
    return logits.reshape(T, B, nclasses)


# ----------------------------------------------------------------------------
if __name__ == "__main__":
    cnn_cfg = [(1, 8), 'M', (1, 16)]     # small but structurally faithful config
    rnn_cfg = (32, 1)                    # (hidden, num_layers)
    nclasses = 10

    key = jax.random.PRNGKey(0)
    pkey, xkey = jax.random.split(key)
    params = init_params(pkey, cnn_cfg, rnn_cfg, nclasses)

    # input: NCHW, single channel (as in the PyTorch module)
    x = jax.random.normal(xkey, (2, 1, 16, 32), jnp.float32)

    out = htrnet_forward(params, x)
    out = jax.block_until_ready(out)

    # expected: (seq_len = W/2 = 16, batch = 2, nclasses)
    assert out.shape == (16, 2, nclasses), out.shape
    assert out.dtype == jnp.float32
    print("KERNEL_OK")
</pallas_src>

<mosaic_0001>
module attributes {stable_mosaic.version = 11 : i64} {
  func.func @_conv3x3_kernel(%arg0: i32, %arg1: memref<2x1x34x8xbf16, #tpu.memory_space<vmem>>, %arg2: memref<2x1x34x8xbf16, #tpu.memory_space<vmem>>, %arg3: memref<2x1x34x8xbf16, #tpu.memory_space<vmem>>, %arg4: memref<9x8x8xbf16, #tpu.memory_space<vmem>>, %arg5: memref<1x8xf32, #tpu.memory_space<vmem>>, %arg6: memref<1x8xf32, #tpu.memory_space<vmem>>, %arg7: memref<2x1x32x8xbf16, #tpu.memory_space<vmem>>) attributes {dimension_semantics = [#tpu.dimension_semantics<parallel>], iteration_bounds = array<i64: 16>, scalar_prefetch = 0 : i64, scratch_operands = 0 : i64, tpu.core_type = #tpu.core_type<tc>, window_params = [{transform_indices = @transform_0, window_bounds = array<i64: 2, 1, 34, 8>}, {transform_indices = @transform_1, window_bounds = array<i64: 2, 1, 34, 8>}, {transform_indices = @transform_2, window_bounds = array<i64: 2, 1, 34, 8>}, {pipeline_mode = #tpu.pipeline_mode<synchronous>, transform_indices = @transform_3, window_bounds = array<i64: 9, 8, 8>}, {pipeline_mode = #tpu.pipeline_mode<synchronous>, transform_indices = @transform_4, window_bounds = array<i64: 1, 8>}, {pipeline_mode = #tpu.pipeline_mode<synchronous>, transform_indices = @transform_5, window_bounds = array<i64: 1, 8>}, {transform_indices = @transform_6, window_bounds = array<i64: 2, 1, 32, 8>}]} {
    %c0 = arith.constant 0 : index
    %c0_0 = arith.constant 0 : index
    %c0_1 = arith.constant 0 : index
    %c0_2 = arith.constant 0 : index
    %0 = vector.load %arg1[%c0, %c0_0, %c0_1, %c0_2] : memref<2x1x34x8xbf16, #tpu.memory_space<vmem>>, vector<1x1x32x8xbf16>
    %1 = vector.shape_cast %0 : vector<1x1x32x8xbf16> to vector<32x8xbf16>
    %c0_3 = arith.constant 0 : index
    %c0_4 = arith.constant 0 : index
    %c0_5 = arith.constant 0 : index
    %2 = vector.load %arg4[%c0_3, %c0_4, %c0_5] : memref<9x8x8xbf16, #tpu.memory_space<vmem>>, vector<1x8x8xbf16>
    %3 = vector.shape_cast %2 : vector<1x8x8xbf16> to vector<8x8xbf16>
    %cst = arith.constant dense<0.000000e+00> : vector<32x8xf32>
    %4 = tpu.matmul %1, %3, %cst {dimension_numbers = #tpu.dot_dimension_numbers<[1], [0], [0], [1], [0, 0, 1, 1], [], []>} : vector<32x8xbf16>, vector<8x8xbf16>, vector<32x8xf32> -> vector<32x8xf32>
    %c0_6 = arith.constant 0 : index
    %c0_7 = arith.constant 0 : index
    %c1 = arith.constant 1 : index
    %c0_8 = arith.constant 0 : index
    %5 = vector.load %arg1[%c0_6, %c0_7, %c1, %c0_8] : memref<2x1x34x8xbf16, #tpu.memory_space<vmem>>, vector<1x1x32x8xbf16>
    %6 = vector.shape_cast %5 : vector<1x1x32x8xbf16> to vector<32x8xbf16>
    %c1_9 = arith.constant 1 : index
    %c0_10 = arith.constant 0 : index
    %c0_11 = arith.constant 0 : index
    %7 = vector.load %arg4[%c1_9, %c0_10, %c0_11] : memref<9x8x8xbf16, #tpu.memory_space<vmem>>, vector<1x8x8xbf16>
    %8 = vector.shape_cast %7 : vector<1x8x8xbf16> to vector<8x8xbf16>
    %cst_12 = arith.constant dense<0.000000e+00> : vector<32x8xf32>
    %9 = tpu.matmul %6, %8, %cst_12 {dimension_numbers = #tpu.dot_dimension_numbers<[1], [0], [0], [1], [0, 0, 1, 1], [], []>} : vector<32x8xbf16>, vector<8x8xbf16>, vector<32x8xf32> -> vector<32x8xf32>
    %10 = arith.addf %4, %9 : vector<32x8xf32>
    %c0_13 = arith.constant 0 : index
    %c0_14 = arith.constant 0 : index
    %c2 = arith.constant 2 : index
    %c0_15 = arith.constant 0 : index
    %11 = vector.load %arg1[%c0_13, %c0_14, %c2, %c0_15] : memref<2x1x34x8xbf16, #tpu.memory_space<vmem>>, vector<1x1x32x8xbf16>
    %12 = vector.shape_cast %11 : vector<1x1x32x8xbf16> to vector<32x8xbf16>
    %c2_16 = arith.constant 2 : index
    %c0_17 = arith.constant 0 : index
    %c0_18 = arith.constant 0 : index
    %13 = vector.load %arg4[%c2_16, %c0_17, %c0_18] : memref<9x8x8xbf16, #tpu.memory_space<vmem>>, vector<1x8x8xbf16>
    %14 = vector.shape_cast %13 : vector<1x8x8xbf16> to vector<8x8xbf16>
    %cst_19 = arith.constant dense<0.000000e+00> : vector<32x8xf32>
    %15 = tpu.matmul %12, %14, %cst_19 {dimension_numbers = #tpu.dot_dimension_numbers<[1], [0], [0], [1], [0, 0, 1, 1], [], []>} : vector<32x8xbf16>, vector<8x8xbf16>, vector<32x8xf32> -> vector<32x8xf32>
    %16 = arith.addf %10, %15 : vector<32x8xf32>
    %c0_20 = arith.constant 0 : index
    %c0_21 = arith.constant 0 : index
    %c0_22 = arith.constant 0 : index
    %c0_23 = arith.constant 0 : index
    %17 = vector.load %arg2[%c0_20, %c0_21, %c0_22, %c0_23] : memref<2x1x34x8xbf16, #tpu.memory_space<vmem>>, vector<1x1x32x8xbf16>
    %18 = vector.shape_cast %17 : vector<1x1x32x8xbf16> to vector<32x8xbf16>
    %c3 = arith.constant 3 : index
    %c0_24 = arith.constant 0 : index
    %c0_25 = arith.constant 0 : index
    %19 = vector.load %arg4[%c3, %c0_24, %c0_25] : memref<9x8x8xbf16, #tpu.memory_space<vmem>>, vector<1x8x8xbf16>
    %20 = vector.shape_cast %19 : vector<1x8x8xbf16> to vector<8x8xbf16>
    %cst_26 = arith.constant dense<0.000000e+00> : vector<32x8xf32>
    %21 = tpu.matmul %18, %20, %cst_26 {dimension_numbers = #tpu.dot_dimension_numbers<[1], [0], [0], [1], [0, 0, 1, 1], [], []>} : vector<32x8xbf16>, vector<8x8xbf16>, vector<32x8xf32> -> vector<32x8xf32>
    %22 = arith.addf %16, %21 : vector<32x8xf32>
    %c0_27 = arith.constant 0 : index
    %c0_28 = arith.constant 0 : index
    %c1_29 = arith.constant 1 : index
    %c0_30 = arith.constant 0 : index
    %23 = vector.load %arg2[%c0_27, %c0_28, %c1_29, %c0_30] : memref<2x1x34x8xbf16, #tpu.memory_space<vmem>>, vector<1x1x32x8xbf16>
    %24 = vector.shape_cast %23 : vector<1x1x32x8xbf16> to vector<32x8xbf16>
    %c4 = arith.constant 4 : index
    %c0_31 = arith.constant 0 : index
    %c0_32 = arith.constant 0 : index
    %25 = vector.load %arg4[%c4, %c0_31, %c0_32] : memref<9x8x8xbf16, #tpu.memory_space<vmem>>, vector<1x8x8xbf16>
    %26 = vector.shape_cast %25 : vector<1x8x8xbf16> to vector<8x8xbf16>
    %cst_33 = arith.constant dense<0.000000e+00> : vector<32x8xf32>
    %27 = tpu.matmul %24, %26, %cst_33 {dimension_numbers = #tpu.dot_dimension_numbers<[1], [0], [0], [1], [0, 0, 1, 1], [], []>} : vector<32x8xbf16>, vector<8x8xbf16>, vector<32x8xf32> -> vector<32x8xf32>
    %28 = arith.addf %22, %27 : vector<32x8xf32>
    %c0_34 = arith.constant 0 : index
    %c0_35 = arith.constant 0 : index
    %c2_36 = arith.constant 2 : index
    %c0_37 = arith.constant 0 : index
    %29 = vector.load %arg2[%c0_34, %c0_35, %c2_36, %c0_37] : memref<2x1x34x8xbf16, #tpu.memory_space<vmem>>, vector<1x1x32x8xbf16>
    %30 = vector.shape_cast %29 : vector<1x1x32x8xbf16> to vector<32x8xbf16>
    %c5 = arith.constant 5 : index
    %c0_38 = arith.constant 0 : index
    %c0_39 = arith.constant 0 : index
    %31 = vector.load %arg4[%c5, %c0_38, %c0_39] : memref<9x8x8xbf16, #tpu.memory_space<vmem>>, vector<1x8x8xbf16>
    %32 = vector.shape_cast %31 : vector<1x8x8xbf16> to vector<8x8xbf16>
    %cst_40 = arith.constant dense<0.000000e+00> : vector<32x8xf32>
    %33 = tpu.matmul %30, %32, %cst_40 {dimension_numbers = #tpu.dot_dimension_numbers<[1], [0], [0], [1], [0, 0, 1, 1], [], []>} : vector<32x8xbf16>, vector<8x8xbf16>, vector<32x8xf32> -> vector<32x8xf32>
    %34 = arith.addf %28, %33 : vector<32x8xf32>
    %c0_41 = arith.constant 0 : index
    %c0_42 = arith.constant 0 : index
    %c0_43 = arith.constant 0 : index
    %c0_44 = arith.constant 0 : index
    %35 = vector.load %arg3[%c0_41, %c0_42, %c0_43, %c0_44] : memref<2x1x34x8xbf16, #tpu.memory_space<vmem>>, vector<1x1x32x8xbf16>
    %36 = vector.shape_cast %35 : vector<1x1x32x8xbf16> to vector<32x8xbf16>
    %c6 = arith.constant 6 : index
    %c0_45 = arith.constant 0 : index
    %c0_46 = arith.constant 0 : index
    %37 = vector.load %arg4[%c6, %c0_45, %c0_46] : memref<9x8x8xbf16, #tpu.memory_space<vmem>>, vector<1x8x8xbf16>
    %38 = vector.shape_cast %37 : vector<1x8x8xbf16> to vector<8x8xbf16>
    %cst_47 = arith.constant dense<0.000000e+00> : vector<32x8xf32>
    %39 = tpu.matmul %36, %38, %cst_47 {dimension_numbers = #tpu.dot_dimension_numbers<[1], [0], [0], [1], [0, 0, 1, 1], [], []>} : vector<32x8xbf16>, vector<8x8xbf16>, vector<32x8xf32> -> vector<32x8xf32>
    %40 = arith.addf %34, %39 : vector<32x8xf32>
    %c0_48 = arith.constant 0 : index
    %c0_49 = arith.constant 0 : index
    %c1_50 = arith.constant 1 : index
    %c0_51 = arith.constant 0 : index
    %41 = vector.load %arg3[%c0_48, %c0_49, %c1_50, %c0_51] : memref<2x1x34x8xbf16, #tpu.memory_space<vmem>>, vector<1x1x32x8xbf16>
    %42 = vector.shape_cast %41 : vector<1x1x32x8xbf16> to vector<32x8xbf16>
    %c7 = arith.constant 7 : index
    %c0_52 = arith.constant 0 : index
    %c0_53 = arith.constant 0 : index
    %43 = vector.load %arg4[%c7, %c0_52, %c0_53] : memref<9x8x8xbf16, #tpu.memory_space<vmem>>, vector<1x8x8xbf16>
    %44 = vector.shape_cast %43 : vector<1x8x8xbf16> to vector<8x8xbf16>
    %cst_54 = arith.constant dense<0.000000e+00> : vector<32x8xf32>
    %45 = tpu.matmul %42, %44, %cst_54 {dimension_numbers = #tpu.dot_dimension_numbers<[1], [0], [0], [1], [0, 0, 1, 1], [], []>} : vector<32x8xbf16>, vector<8x8xbf16>, vector<32x8xf32> -> vector<32x8xf32>
    %46 = arith.addf %40, %45 : vector<32x8xf32>
    %c0_55 = arith.constant 0 : index
    %c0_56 = arith.constant 0 : index
    %c2_57 = arith.constant 2 : index
    %c0_58 = arith.constant 0 : index
    %47 = vector.load %arg3[%c0_55, %c0_56, %c2_57, %c0_58] : memref<2x1x34x8xbf16, #tpu.memory_space<vmem>>, vector<1x1x32x8xbf16>
    %48 = vector.shape_cast %47 : vector<1x1x32x8xbf16> to vector<32x8xbf16>
    %c8 = arith.constant 8 : index
    %c0_59 = arith.constant 0 : index
    %c0_60 = arith.constant 0 : index
    %49 = vector.load %arg4[%c8, %c0_59, %c0_60] : memref<9x8x8xbf16, #tpu.memory_space<vmem>>, vector<1x8x8xbf16>
    %50 = vector.shape_cast %49 : vector<1x8x8xbf16> to vector<8x8xbf16>
    %cst_61 = arith.constant dense<0.000000e+00> : vector<32x8xf32>
    %51 = tpu.matmul %48, %50, %cst_61 {dimension_numbers = #tpu.dot_dimension_numbers<[1], [0], [0], [1], [0, 0, 1, 1], [], []>} : vector<32x8xbf16>, vector<8x8xbf16>, vector<32x8xf32> -> vector<32x8xf32>
    %52 = arith.addf %46, %51 : vector<32x8xf32>
    %c0_62 = arith.constant 0 : index
    %c0_63 = arith.constant 0 : index
    %53 = vector.load %arg5[%c0_62, %c0_63] : memref<1x8xf32, #tpu.memory_space<vmem>>, vector<1x8xf32>
    %54 = vector.broadcast %53 : vector<1x8xf32> to vector<32x8xf32>
    %55 = arith.mulf %52, %54 : vector<32x8xf32>
    %c0_64 = arith.constant 0 : index
    %c0_65 = arith.constant 0 : index
    %56 = vector.load %arg6[%c0_64, %c0_65] : memref<1x8xf32, #tpu.memory_space<vmem>>, vector<1x8xf32>
    %57 = vector.broadcast %56 : vector<1x8xf32> to vector<32x8xf32>
    %58 = arith.addf %55, %57 : vector<32x8xf32>
    %cst_66 = arith.constant 0.000000e+00 : f32
    %59 = vector.broadcast %cst_66 : f32 to vector<32x8xf32>
    %60 = arith.maximumf %58, %59 : vector<32x8xf32>
    %61 = arith.truncf %60 : vector<32x8xf32> to vector<32x8xbf16>
    %c0_67 = arith.constant 0 : index
    %c0_68 = arith.constant 0 : index
    %c0_69 = arith.constant 0 : index
    %c0_70 = arith.constant 0 : index
    %62 = vector.load %arg7[%c0_67, %c0_68, %c0_69, %c0_70] : memref<2x1x32x8xbf16, #tpu.memory_space<vmem>>, vector<1x1x32x8xbf16>
    %63 = vector.shape_cast %62 : vector<1x1x32x8xbf16> to vector<32x8xbf16>
    %64 = vector.shape_cast %61 : vector<32x8xbf16> to vector<1x1x32x8xbf16>
    tpu.vector_store %arg7[%c0_67, %c0_68, %c0_69, %c0_70], %64 {strides = array<i32>} : memref<2x1x32x8xbf16, #tpu.memory_space<vmem>>, vector<1x1x32x8xbf16>,
    %c1_71 = arith.constant 1 : index
    %c0_72 = arith.constant 0 : index
    %c0_73 = arith.constant 0 : index
    %c0_74 = arith.constant 0 : index
    %65 = vector.load %arg1[%c1_71, %c0_72, %c0_73, %c0_74] : memref<2x1x34x8xbf16, #tpu.memory_space<vmem>>, vector<1x1x32x8xbf16>
    %66 = vector.shape_cast %65 : vector<1x1x32x8xbf16> to vector<32x8xbf16>
    %c0_75 = arith.constant 0 : index
    %c0_76 = arith.constant 0 : index
    %c0_77 = arith.constant 0 : index
    %67 = vector.load %arg4[%c0_75, %c0_76, %c0_77] : memref<9x8x8xbf16, #tpu.memory_space<vmem>>, vector<1x8x8xbf16>
    %68 = vector.shape_cast %67 : vector<1x8x8xbf16> to vector<8x8xbf16>
    %cst_78 = arith.constant dense<0.000000e+00> : vector<32x8xf32>
    %69 = tpu.matmul %66, %68, %cst_78 {dimension_numbers = #tpu.dot_dimension_numbers<[1], [0], [0], [1], [0, 0, 1, 1], [], []>} : vector<32x8xbf16>, vector<8x8xbf16>, vector<32x8xf32> -> vector<32x8xf32>
    %c1_79 = arith.constant 1 : index
    %c0_80 = arith.constant 0 : index
    %c1_81 = arith.constant 1 : index
    %c0_82 = arith.constant 0 : index
    %70 = vector.load %arg1[%c1_79, %c0_80, %c1_81, %c0_82] : memref<2x1x34x8xbf16, #tpu.memory_space<vmem>>, vector<1x1x32x8xbf16>
    %71 = vector.shape_cast %70 : vector<1x1x32x8xbf16> to vector<32x8xbf16>
    %c1_83 = arith.constant 1 : index
    %c0_84 = arith.constant 0 : index
    %c0_85 = arith.constant 0 : index
    %72 = vector.load %arg4[%c1_83, %c0_84, %c0_85] : memref<9x8x8xbf16, #tpu.memory_space<vmem>>, vector<1x8x8xbf16>
    %73 = vector.shape_cast %72 : vector<1x8x8xbf16> to vector<8x8xbf16>
    %cst_86 = arith.constant dense<0.000000e+00> : vector<32x8xf32>
    %74 = tpu.matmul %71, %73, %cst_86 {dimension_numbers = #tpu.dot_dimension_numbers<[1], [0], [0], [1], [0, 0, 1, 1], [], []>} : vector<32x8xbf16>, vector<8x8xbf16>, vector<32x8xf32> -> vector<32x8xf32>
    %75 = arith.addf %69, %74 : vector<32x8xf32>
    %c1_87 = arith.constant 1 : index
    %c0_88 = arith.constant 0 : index
    %c2_89 = arith.constant 2 : index
    %c0_90 = arith.constant 0 : index
    %76 = vector.load %arg1[%c1_87, %c0_88, %c2_89, %c0_90] : memref<2x1x34x8xbf16, #tpu.memory_space<vmem>>, vector<1x1x32x8xbf16>
    %77 = vector.shape_cast %76 : vector<1x1x32x8xbf16> to vector<32x8xbf16>
    %c2_91 = arith.constant 2 : index
    %c0_92 = arith.constant 0 : index
    %c0_93 = arith.constant 0 : index
    %78 = vector.load %arg4[%c2_91, %c0_92, %c0_93] : memref<9x8x8xbf16, #tpu.memory_space<vmem>>, vector<1x8x8xbf16>
    %79 = vector.shape_cast %78 : vector<1x8x8xbf16> to vector<8x8xbf16>
    %cst_94 = arith.constant dense<0.000000e+00> : vector<32x8xf32>
    %80 = tpu.matmul %77, %79, %cst_94 {dimension_numbers = #tpu.dot_dimension_numbers<[1], [0], [0], [1], [0, 0, 1, 1], [], []>} : vector<32x8xbf16>, vector<8x8xbf16>, vector<32x8xf32> -> vector<32x8xf32>
    %81 = arith.addf %75, %80 : vector<32x8xf32>
    %c1_95 = arith.constant 1 : index
    %c0_96 = arith.constant 0 : index
    %c0_97 = arith.constant 0 : index
    %c0_98 = arith.constant 0 : index
    %82 = vector.load %arg2[%c1_95, %c0_96, %c0_97, %c0_98] : memref<2x1x34x8xbf16, #tpu.memory_space<vmem>>, vector<1x1x32x8xbf16>
    %83 = vector.shape_cast %82 : vector<1x1x32x8xbf16> to vector<32x8xbf16>
    %c3_99 = arith.constant 3 : index
    %c0_100 = arith.constant 0 : index
    %c0_101 = arith.constant 0 : index
    %84 = vector.load %arg4[%c3_99, %c0_100, %c0_101] : memref<9x8x8xbf16, #tpu.memory_space<vmem>>, vector<1x8x8xbf16>
    %85 = vector.shape_cast %84 : vector<1x8x8xbf16> to vector<8x8xbf16>
    %cst_102 = arith.constant dense<0.000000e+00> : vector<32x8xf32>
    %86 = tpu.matmul %83, %85, %cst_102 {dimension_numbers = #tpu.dot_dimension_numbers<[1], [0], [0], [1], [0, 0, 1, 1], [], []>} : vector<32x8xbf16>, vector<8x8xbf16>, vector<32x8xf32> -> vector<32x8xf32>
    %87 = arith.addf %81, %86 : vector<32x8xf32>
    %c1_103 = arith.constant 1 : index
    %c0_104 = arith.constant 0 : index
    %c1_105 = arith.constant 1 : index
    %c0_106 = arith.constant 0 : index
    %88 = vector.load %arg2[%c1_103, %c0_104, %c1_105, %c0_106] : memref<2x1x34x8xbf16, #tpu.memory_space<vmem>>, vector<1x1x32x8xbf16>
    %89 = vector.shape_cast %88 : vector<1x1x32x8xbf16> to vector<32x8xbf16>
    %c4_107 = arith.constant 4 : index
    %c0_108 = arith.constant 0 : index
    %c0_109 = arith.constant 0 : index
    %90 = vector.load %arg4[%c4_107, %c0_108, %c0_109] : memref<9x8x8xbf16, #tpu.memory_space<vmem>>, vector<1x8x8xbf16>
    %91 = vector.shape_cast %90 : vector<1x8x8xbf16> to vector<8x8xbf16>
    %cst_110 = arith.constant dense<0.000000e+00> : vector<32x8xf32>
    %92 = tpu.matmul %89, %91, %cst_110 {dimension_numbers = #tpu.dot_dimension_numbers<[1], [0], [0], [1], [0, 0, 1, 1], [], []>} : vector<32x8xbf16>, vector<8x8xbf16>, vector<32x8xf32> -> vector<32x8xf32>
    %93 = arith.addf %87, %92 : vector<32x8xf32>
    %c1_111 = arith.constant 1 : index
    %c0_112 = arith.constant 0 : index
    %c2_113 = arith.constant 2 : index
    %c0_114 = arith.constant 0 : index
    %94 = vector.load %arg2[%c1_111, %c0_112, %c2_113, %c0_114] : memref<2x1x34x8xbf16, #tpu.memory_space<vmem>>, vector<1x1x32x8xbf16>
    %95 = vector.shape_cast %94 : vector<1x1x32x8xbf16> to vector<32x8xbf16>
    %c5_115 = arith.constant 5 : index
    %c0_116 = arith.constant 0 : index
    %c0_117 = arith.constant 0 : index
    %96 = vector.load %arg4[%c5_115, %c0_116, %c0_117] : memref<9x8x8xbf16, #tpu.memory_space<vmem>>, vector<1x8x8xbf16>
    %97 = vector.shape_cast %96 : vector<1x8x8xbf16> to vector<8x8xbf16>
    %cst_118 = arith.constant dense<0.000000e+00> : vector<32x8xf32>
    %98 = tpu.matmul %95, %97, %cst_118 {dimension_numbers = #tpu.dot_dimension_numbers<[1], [0], [0], [1], [0, 0, 1, 1], [], []>} : vector<32x8xbf16>, vector<8x8xbf16>, vector<32x8xf32> -> vector<32x8xf32>
    %99 = arith.addf %93, %98 : vector<32x8xf32>
    %c1_119 = arith.constant 1 : index
    %c0_120 = arith.constant 0 : index
    %c0_121 = arith.constant 0 : index
    %c0_122 = arith.constant 0 : index
    %100 = vector.load %arg3[%c1_119, %c0_120, %c0_121, %c0_122] : memref<2x1x34x8xbf16, #tpu.memory_space<vmem>>, vector<1x1x32x8xbf16>
    %101 = vector.shape_cast %100 : vector<1x1x32x8xbf16> to vector<32x8xbf16>
    %c6_123 = arith.constant 6 : index
    %c0_124 = arith.constant 0 : index
    %c0_125 = arith.constant 0 : index
    %102 = vector.load %arg4[%c6_123, %c0_124, %c0_125] : memref<9x8x8xbf16, #tpu.memory_space<vmem>>, vector<1x8x8xbf16>
    %103 = vector.shape_cast %102 : vector<1x8x8xbf16> to vector<8x8xbf16>
    %cst_126 = arith.constant dense<0.000000e+00> : vector<32x8xf32>
    %104 = tpu.matmul %101, %103, %cst_126 {dimension_numbers = #tpu.dot_dimension_numbers<[1], [0], [0], [1], [0, 0, 1, 1], [], []>} : vector<32x8xbf16>, vector<8x8xbf16>, vector<32x8xf32> -> vector<32x8xf32>
    %105 = arith.addf %99, %104 : vector<32x8xf32>
    %c1_127 = arith.constant 1 : index
    %c0_128 = arith.constant 0 : index
    %c1_129 = arith.constant 1 : index
    %c0_130 = arith.constant 0 : index
    %106 = vector.load %arg3[%c1_127, %c0_128, %c1_129, %c0_130] : memref<2x1x34x8xbf16, #tpu.memory_space<vmem>>, vector<1x1x32x8xbf16>
    %107 = vector.shape_cast %106 : vector<1x1x32x8xbf16> to vector<32x8xbf16>
    %c7_131 = arith.constant 7 : index
    %c0_132 = arith.constant 0 : index
    %c0_133 = arith.constant 0 : index
    %108 = vector.load %arg4[%c7_131, %c0_132, %c0_133] : memref<9x8x8xbf16, #tpu.memory_space<vmem>>, vector<1x8x8xbf16>
    %109 = vector.shape_cast %108 : vector<1x8x8xbf16> to vector<8x8xbf16>
    %cst_134 = arith.constant dense<0.000000e+00> : vector<32x8xf32>
    %110 = tpu.matmul %107, %109, %cst_134 {dimension_numbers = #tpu.dot_dimension_numbers<[1], [0], [0], [1], [0, 0, 1, 1], [], []>} : vector<32x8xbf16>, vector<8x8xbf16>, vector<32x8xf32> -> vector<32x8xf32>
    %111 = arith.addf %105, %110 : vector<32x8xf32>
    %c1_135 = arith.constant 1 : index
    %c0_136 = arith.constant 0 : index
    %c2_137 = arith.constant 2 : index
    %c0_138 = arith.constant 0 : index
    %112 = vector.load %arg3[%c1_135, %c0_136, %c2_137, %c0_138] : memref<2x1x34x8xbf16, #tpu.memory_space<vmem>>, vector<1x1x32x8xbf16>
    %113 = vector.shape_cast %112 : vector<1x1x32x8xbf16> to vector<32x8xbf16>
    %c8_139 = arith.constant 8 : index
    %c0_140 = arith.constant 0 : index
    %c0_141 = arith.constant 0 : index
    %114 = vector.load %arg4[%c8_139, %c0_140, %c0_141] : memref<9x8x8xbf16, #tpu.memory_space<vmem>>, vector<1x8x8xbf16>
    %115 = vector.shape_cast %114 : vector<1x8x8xbf16> to vector<8x8xbf16>
    %cst_142 = arith.constant dense<0.000000e+00> : vector<32x8xf32>
    %116 = tpu.matmul %113, %115, %cst_142 {dimension_numbers = #tpu.dot_dimension_numbers<[1], [0], [0], [1], [0, 0, 1, 1], [], []>} : vector<32x8xbf16>, vector<8x8xbf16>, vector<32x8xf32> -> vector<32x8xf32>
    %117 = arith.addf %111, %116 : vector<32x8xf32>
    %c0_143 = arith.constant 0 : index
    %c0_144 = arith.constant 0 : index
    %118 = vector.load %arg5[%c0_143, %c0_144] : memref<1x8xf32, #tpu.memory_space<vmem>>, vector<1x8xf32>
    %119 = vector.broadcast %118 : vector<1x8xf32> to vector<32x8xf32>
    %120 = arith.mulf %117, %119 : vector<32x8xf32>
    %c0_145 = arith.constant 0 : index
    %c0_146 = arith.constant 0 : index
    %121 = vector.load %arg6[%c0_145, %c0_146] : memref<1x8xf32, #tpu.memory_space<vmem>>, vector<1x8xf32>
    %122 = vector.broadcast %121 : vector<1x8xf32> to vector<32x8xf32>
    %123 = arith.addf %120, %122 : vector<32x8xf32>
    %cst_147 = arith.constant 0.000000e+00 : f32
    %124 = vector.broadcast %cst_147 : f32 to vector<32x8xf32>
    %125 = arith.maximumf %123, %124 : vector<32x8xf32>
    %126 = arith.truncf %125 : vector<32x8xf32> to vector<32x8xbf16>
    %c1_148 = arith.constant 1 : index
    %c0_149 = arith.constant 0 : index
    %c0_150 = arith.constant 0 : index
    %c0_151 = arith.constant 0 : index
    %127 = vector.load %arg7[%c1_148, %c0_149, %c0_150, %c0_151] : memref<2x1x32x8xbf16, #tpu.memory_space<vmem>>, vector<1x1x32x8xbf16>
    %128 = vector.shape_cast %127 : vector<1x1x32x8xbf16> to vector<32x8xbf16>
    %129 = vector.shape_cast %126 : vector<32x8xbf16> to vector<1x1x32x8xbf16>
    tpu.vector_store %arg7[%c1_148, %c0_149, %c0_150, %c0_151], %129 {strides = array<i32>} : memref<2x1x32x8xbf16, #tpu.memory_space<vmem>>, vector<1x1x32x8xbf16>,
    return
  }
  func.func @transform_0(%arg0: i32) -> (i32, i32, i32, i32) {
    %c0_i32 = arith.constant 0 : i32
    %0 = arith.addi %arg0, %c0_i32 : i32
    %c0_i32_0 = arith.constant 0 : i32
    %c0_i32_1 = arith.constant 0 : i32
    %c0_i32_2 = arith.constant 0 : i32
    %c0_i32_3 = arith.constant 0 : i32
    return %c0_i32_0, %0, %c0_i32_1, %c0_i32_2 : i32, i32, i32, i32
  }
  func.func @transform_1(%arg0: i32) -> (i32, i32, i32, i32) {
    %c1_i32 = arith.constant 1 : i32
    %0 = arith.addi %arg0, %c1_i32 : i32
    %c0_i32 = arith.constant 0 : i32
    %c0_i32_0 = arith.constant 0 : i32
    %c0_i32_1 = arith.constant 0 : i32
    %c0_i32_2 = arith.constant 0 : i32
    return %c0_i32, %0, %c0_i32_0, %c0_i32_1 : i32, i32, i32, i32
  }
  func.func @transform_2(%arg0: i32) -> (i32, i32, i32, i32) {
    %c2_i32 = arith.constant 2 : i32
    %0 = arith.addi %arg0, %c2_i32 : i32
    %c0_i32 = arith.constant 0 : i32
    %c0_i32_0 = arith.constant 0 : i32
    %c0_i32_1 = arith.constant 0 : i32
    %c0_i32_2 = arith.constant 0 : i32
    return %c0_i32, %0, %c0_i32_0, %c0_i32_1 : i32, i32, i32, i32
  }
  func.func @transform_3(%arg0: i32) -> (i32, i32, i32) {
    %c0_i32 = arith.constant 0 : i32
    %c0_i32_0 = arith.constant 0 : i32
    %c0_i32_1 = arith.constant 0 : i32
    %c0_i32_2 = arith.constant 0 : i32
    return %c0_i32, %c0_i32_0, %c0_i32_1 : i32, i32, i32
  }
  func.func @transform_4(%arg0: i32) -> (i32, i32) {
    %c0_i32 = arith.constant 0 : i32
    %c0_i32_0 = arith.constant 0 : i32
    %c0_i32_1 = arith.constant 0 : i32
    return %c0_i32, %c0_i32_0 : i32, i32
  }
  func.func @transform_5(%arg0: i32) -> (i32, i32) {
    %c0_i32 = arith.constant 0 : i32
    %c0_i32_0 = arith.constant 0 : i32
    %c0_i32_1 = arith.constant 0 : i32
    return %c0_i32, %c0_i32_0 : i32, i32
  }
  func.func @transform_6(%arg0: i32) -> (i32, i32, i32, i32) {
    %c0_i32 = arith.constant 0 : i32
    %c0_i32_0 = arith.constant 0 : i32
    %c0_i32_1 = arith.constant 0 : i32
    %c0_i32_2 = arith.constant 0 : i32
    return %c0_i32, %arg0, %c0_i32_0, %c0_i32_1 : i32, i32, i32, i32
  }
}

</mosaic_0001>

<bundles_post_ra>
// kernel: tpu_custom_call.1
= control target key start
LH: loop header
LB: loop body
LE: loop exit
PB: predicated region body
PF: predicated region fallthrough
CT: control target
= control target key end

     0   :  { %s2858_s21 = smov 0   ;;  %s2860_s22 = smov 0   ;;  %s3291_s0 = inlined_call_operand.vmem [shape: bf16[2,18,34,8], index: 0, kind: input, shape index: {}]   ;;  %s3292_s1 = inlined_call_operand.vmem [shape: bf16[2,18,34,8], index: 1, kind: input, shape index: {}]   ;;  %s3293_s2 = inlined_call_operand.vmem [shape: bf16[2,18,34,8], index: 2, kind: input, shape index: {}]   ;;  %s3294_s3 = inlined_call_operand.vmem [shape: bf16[9,8,8], index: 3, kind: input, shape index: {}]   ;;  %s3295_s4 = inlined_call_operand.vmem [shape: f32[1,8], index: 4, kind: input, shape index: {}]   ;;  %s3296_s5 = inlined_call_operand.vmem [shape: f32[1,8], index: 5, kind: input, shape index: {}]   ;;  %s3297_s6 = inlined_call_operand.vmem [shape: bf16[2,16,32,8], index: 6, kind: output, shape index: {}]  }
   0x1   :  { %s2862_s23 = smov 0   ;;  %s2864_s24 = smov 0  }
   0x2   :  { %s2866_s25 = smov 0   ;;  %s2868_s26 = smov 0  }
   0x3   :  { %s2870_s27 = smov 0  }
   0x4 LB: > { %s2261_s28 = sadd.s32 4294967295, %s2821_s27   ;;  %s2895_s29 = sadd.s32 1, %s2821_s27   ;;  %s2821_s27 = sphi %s2870_s27, %s3308_s27   ;;  %s2817_s26 = sphi %s2868_s26, %s3307_s26   ;;  %s2813_s25 = sphi %s2866_s25, %s3306_s25   ;;  %s2809_s24 = sphi %s2864_s24, %s3305_s24   ;;  %s2805_s23 = sphi %s2862_s23, %s3304_s23   ;;  %s2801_s22 = sphi %s2860_s22, %s3303_s22   ;;  %s2797_s21 = sphi %s2858_s21, %s3302_s21  }
   0x5   : > { %s20_s30 = ssub.s32 %s2821_s27, %s2895_s29  ;;  %s23_s7 = sadd.s32 1, %s2817_s26 }
   0x6   : > { %p21_p0 = scmp.eq.s32.totalorder %s20_s30, 0  ;;  %p30_p1 = scmp.ne.s32.totalorder %s2817_s26, %s2813_s25 }
   0x7   : > { %p31_p2 = scmp.eq.s32.totalorder %s2821_s27, 0  ;;  %s47_s8 = sadd.s32 1, %s2895_s29 }
   0x8   : > { %s2905_s9 = scalar_select %p21_p0, %s2817_s26, %s23_s7  }
   0x9   : > { %p2912_p3 = por %p31_p2, %p30_p1  ;;  %s48_s11 = ssub.s32 %s2895_s29, %s47_s8 }
   0xa   : > { %p49_p4 = scmp.eq.s32.totalorder %s48_s11, 0  ;;  %s51_s12 = sadd.s32 1, %s2809_s24 }
   0xb   : > { %p58_p5 = scmp.ne.s32.totalorder %s2809_s24, %s2805_s23  ;;  %s74_s13 = sadd.s32 2, %s2821_s27 }
   0xc   : > { %s2922_s14 = scalar_select %p49_p4, %s2809_s24, %s51_s12  }
   0xd   : > { %p2926_p6 = por %p58_p5, %p31_p2  ;;  %s75_s16 = sadd.s32 2, %s2895_s29 }
   0xe   : > { %s76_s17 = ssub.s32 %s74_s13, %s75_s16  ;;  %s79_s18 = sadd.s32 1, %s2801_s22 }
   0xf   : > { %p77_p7 = scmp.eq.s32.totalorder %s76_s17, 0  ;;  %p86_p8 = scmp.ne.s32.totalorder %s2801_s22, %s2797_s21 }
  0x10   : > { %p179_p9 = scmp.eq.s32.totalorder %s2261_s28, 15  ;;  %p2264_p12 = scmp.ge.s32.totalorder %s2821_s27, 16 }
  0x11   : > { %s2937_s19 = scalar_select %p77_p7, %s2801_s22, %s79_s18  }
  0x12   : > { %p2941_p10 = por %p86_p8, %p31_p2  ;;  %p2948_p11 = por %p179_p9, %p30_p1 }
  0x13   : > { %210 = sbr.rel (%p2264_p12) target bundleno = 50 (0x32), region = 28 }
  0x1a   : > { %213 = sbr.rel (!%p2912_p3) target bundleno = 34 (0x22), region = 32  ;;  %s215_s7 = sand.u32 (%p2912_p3), 1, %s2817_s26  }
  0x1b   : > { %s2673_s8 = smul.u32 (%p2912_p3), 20, %s2821_s27 }
  0x1c   : > { %s2672_s11 = smul.u32 (%p2912_p3), 40, %s215_s7 }
  0x1d   : > { %s220_s16 = scalar_lea.vmem (%p2912_p3), %s3291_s0, %s2673_s8 }
  0x1e   : > { %v236_v0 = vld [vmem:[%s220_s16] sm:$0xff] (%p2912_p3)   ;;  %v240_v1 = vld [vmem:[%s220_s16 + $0x8] sm:$0xff] (%p2912_p3)   ;;  %v244_v2 = vld [vmem:[%s220_s16 + $0x10] sm:$0xf] (%p2912_p3)  ;;  %s217_s17 = scalar_lea.vmem (%p2912_p3), [#allocation2], %s2672_s11 }
  0x1f   : > { %237 = vst [vmem:[%s217_s17] sm:$0xff] (%p2912_p3), %v236_v0   ;;  %241 = vst [vmem:[%s217_s17 + $0x8] sm:$0xff] (%p2912_p3), %v240_v1   ;;  %v246_v3 = vld [vmem:[%s220_s16 + $0x168] sm:$0xff] (%p2912_p3)   ;;  %v250_v4 = vld [vmem:[%s220_s16 + $0x170] sm:$0xff] (%p2912_p3)  }
  0x20   : > { %245 = vst [vmem:[%s217_s17 + $0x10] sm:$0xf] (%p2912_p3), %v244_v2  ;;  %v254_v5 = vld [vmem:[%s220_s16 + $0x178] sm:$0xf] (%p2912_p3)  ;;  %247 = vst [vmem:[%s217_s17 + $0x14] sm:$0xff] (%p2912_p3), %v246_v3  }
  0x21   : > { %251 = vst [vmem:[%s217_s17 + $0x1c] sm:$0xff] %v250_v4   ;;  %255 = vst [vmem:[%s217_s17 + $0x24] sm:$0xf] %v254_v5 }
  0x22 PF: > { %298 = sbr.rel (!%p2926_p6) target bundleno = 42 (0x2a), region = 73  ;;  %s300_s10 = sand.u32 (%p2926_p6), 1, %s2809_s24  }
  0x23   : > { %s2185_s18 = smul.u32 (%p2926_p6), 20, %s2821_s27 }
  0x24   : > { %s2674_s7 = smul.u32 (%p2926_p6), 40, %s300_s10 }
  0x25   : > { %s2186_s12 = scalar_lea.vmem (%p2926_p6), %s3292_s1, %s2185_s18 }
  0x26   : > { %v2266_v6 = vld [vmem:[%s2186_s12 + $0x14] sm:$0xff] (%p2926_p6)   ;;  %v2268_v7 = vld [vmem:[%s2186_s12 + $0x1c] sm:$0xff] (%p2926_p6)   ;;  %v2270_v8 = vld [vmem:[%s2186_s12 + $0x24] sm:$0xf] (%p2926_p6)  ;;  %s302_s13 = scalar_lea.vmem (%p2926_p6), [#allocation3], %s2674_s7 }
  0x27   : > { %323 = vst [vmem:[%s302_s13] sm:$0xff] (%p2926_p6), %v2266_v6   ;;  %327 = vst [vmem:[%s302_s13 + $0x8] sm:$0xff] (%p2926_p6), %v2268_v7   ;;  %v2271_v9 = vld [vmem:[%s2186_s12 + $0x17c] sm:$0xff] (%p2926_p6)   ;;  %v2273_v10 = vld [vmem:[%s2186_s12 + $0x184] sm:$0xff] (%p2926_p6)  }
  0x28   : > { %331 = vst [vmem:[%s302_s13 + $0x10] sm:$0xf] (%p2926_p6), %v2270_v8  ;;  %v2275_v11 = vld [vmem:[%s2186_s12 + $0x18c] sm:$0xf] (%p2926_p6)  ;;  %333 = vst [vmem:[%s302_s13 + $0x14] sm:$0xff] (%p2926_p6), %v2271_v9  }
  0x29   : > { %337 = vst [vmem:[%s302_s13 + $0x1c] sm:$0xff] %v2273_v10   ;;  %341 = vst [vmem:[%s302_s13 + $0x24] sm:$0xf] %v2275_v11 }
  0x2a PF: > { %384 = sbr.rel (!%p2941_p10) target bundleno = 50 (0x32), region = 114  ;;  %s386_s15 = sand.u32 (%p2941_p10), 1, %s2801_s22  }
  0x2b   : > { %s2190_s16 = smul.u32 (%p2941_p10), 20, %s2821_s27 }
  0x2c   : > { %s2675_s17 = smul.u32 (%p2941_p10), 40, %s386_s15 }
  0x2d   : > { %s2191_s7 = scalar_lea.vmem (%p2941_p10), %s3293_s2, %s2190_s16 }
  0x2e   : > { %v2276_v12 = vld [vmem:[%s2191_s7 + $0x28] sm:$0xff] (%p2941_p10)   ;;  %v2278_v13 = vld [vmem:[%s2191_s7 + $0x30] sm:$0xff] (%p2941_p10)   ;;  %v2280_v14 = vld [vmem:[%s2191_s7 + $0x38] sm:$0xf] (%p2941_p10)  ;;  %s388_s8 = scalar_lea.vmem (%p2941_p10), [#allocation4], %s2675_s17 }
  0x2f   : > { %409 = vst [vmem:[%s388_s8] sm:$0xff] (%p2941_p10), %v2276_v12   ;;  %413 = vst [vmem:[%s388_s8 + $0x8] sm:$0xff] (%p2941_p10), %v2278_v13   ;;  %v2281_v15 = vld [vmem:[%s2191_s7 + $0x190] sm:$0xff] (%p2941_p10)   ;;  %v2283_v16 = vld [vmem:[%s2191_s7 + $0x198] sm:$0xff] (%p2941_p10)  }
  0x30   : > { %417 = vst [vmem:[%s388_s8 + $0x10] sm:$0xf] (%p2941_p10), %v2280_v14  ;;  %v2285_v17 = vld [vmem:[%s2191_s7 + $0x1a0] sm:$0xf] (%p2941_p10)  ;;  %419 = vst [vmem:[%s388_s8 + $0x14] sm:$0xff] (%p2941_p10), %v2281_v15  }
  0x31   : > { %423 = vst [vmem:[%s388_s8 + $0x1c] sm:$0xff] %v2283_v16   ;;  %427 = vst [vmem:[%s388_s8 + $0x24] sm:$0xf] %v2285_v17 }
  0x32 PF: > { %p2286_p13 = scmp.ge.s32.totalorder %s2821_s27, 1  ;;  %p469_p0 = scmp.lt.s32.totalorder %s2821_s27, 17 }
  0x34   : > { %p470_p1 = pnand %p2286_p13, %p469_p0 }
  0x35   : > { %v2288_v18 = vld [vmem:[%s3294_s3 + $0x4] sm:$0xf] (!%p470_p1)  ;;  %vm578_vm0 = vcmask (!%p470_p1), 1043456   ;;  %s476_s15 = sand.u32 (!%p470_p1), 1, %s2813_s25   ;;  %v533_v22 = vld [vmem:[%s3294_s3] sm:$0xf] (!%p470_p1) }
  0x36   : > { %473 = sbr.rel (%p470_p1) target bundleno = 399 (0x18f), region = 155  ;;  %v2341_v19 = vld [vmem:[%s3294_s3 + $0x4] sm:$0xf] (!%p470_p1)  ;;  %2654 = vmatprep.subr.msk.bf16.mxu0 (!%p470_p1), %vm578_vm0, %v2288_v18  ;;  %v580_v20 = vsel (!%p470_p1), %vm578_vm0, %v2288_v18, 0  ;;  %v1319_v23 = vld [vmem:[%s3294_s3] sm:$0xf] (!%p470_p1) }
  0x37   : > { %2663 = vmatprep.subr.msk.bf16.mxu1 (!%p470_p1), %vm578_vm0, %v2341_v19  ;;  %v1362_v21 = vsel (!%p470_p1), %vm578_vm0, %v2341_v19, 0  ;;  %s2676_s16 = smul.u32 (!%p470_p1), 40, %s476_s15  ;;  %2483 = vmatpush3.bf16.msra.mxu0 (!%p470_p1), %v580_v20  ;;  %vm550_vm1 = vsmask.f32 (!%p470_p1), 7424  ;;  %s483_s20 = sand.u32 (!%p470_p1), 1, %s2805_s23   ;;  %vm571_vm2 = vcmask (!%p470_p1), 64512  }
  0x38   : > { %2537 = vmatpush3.bf16.msra.mxu1 (!%p470_p1), %v1362_v21  ;;  %2655 = vmatprep.subr.msk.bf16.mxu0 (!%p470_p1), %vm578_vm0, %v533_v22  ;;  %s2677_s23 = smul.u32 (!%p470_p1), 40, %s483_s20  ;;  %v636_v53 = vsel (!%p470_p1), %vm578_vm0, %v533_v22, 0  ;;  %v2296_v57 = vld [vmem:[%s3294_s3 + $0x8] sm:$0xf] (!%p470_p1)  ;;  %v1418_v59 = vsel (!%p470_p1), %vm578_vm0, %v1319_v23, 0  ;;  %s490_s10 = sand.u32 (!%p470_p1), 1, %s2797_s21  }
  0x39   : > { %2664 = vmatprep.subr.msk.bf16.mxu1 (!%p470_p1), %vm578_vm0, %v1319_v23  ;;  %s2997_s8 = scalar_lea.vmem (!%p470_p1), [#allocation2], %s2676_s16  ;;  %v2350_v62 = vld [vmem:[%s3294_s3 + $0x8] sm:$0xf] (!%p470_p1)  ;;  %vm693_vm3 = vcmask (!%p470_p1), 1046528   ;;  %s2678_s18 = smul.u32 (!%p470_p1), 40, %s490_s10  ;;  %v706_v6 = vsel (!%p470_p1), %vm578_vm0, %v2296_v57, 0 }
  0x3a   : > { %v529_v24 = vld [vmem:[%s2997_s8] sm:$0xf] (!%p470_p1)  ;;  %v530_v25 = vld [vmem:[%s2997_s8 + $0x4] sm:$0xf] (!%p470_p1)  ;;  %v3002_v27 = vld [vmem:[%s2997_s8 + $0x8] sm:$0xff] (!%p470_p1)   ;;  %s3032_s13 = scalar_lea.vmem (!%p470_p1), [#allocation3], %s2677_s23 }
  0x3b   : > { %v2289_v26 = vcombine.low (!%p470_p1), %v529_v24, %v530_v25  ;;  %v2336_v28 = vld [vmem:[%s2997_s8 + $0x14] sm:$0xf] (!%p470_p1)  ;;  %v2337_v29 = vld [vmem:[%s2997_s8 + $0x18] sm:$0xf] (!%p470_p1)  ;;  %v559_v32 = vshll.u32 (!%p470_p1), %v3002_v27, 16  ;;  %v563_v33 = vshrl.u32 (!%p470_p1), %v3002_v27, 16 }
  0x3c   : > { %v3009_v34 = vld [vmem:[%s2997_s8 + $0x1c] sm:$0xff] (!%p470_p1)   ;;  %v2342_v35 = vcombine.low (!%p470_p1), %v2336_v28, %v2337_v29  ;;  %v3012_v36 = vld [vmem:[%s2997_s8 + $0x10] ss:$0 sps:$4 sm:$0x11] (!%p470_p1)   ;;  %v2349_v0 = vld [vmem:[%s2997_s8 + $0x14] sm:$0xe] (!%p470_p1) }
  0x3d   : > { %v552_v30 = vshrl.u32 %v2289_v26, 16  ;;  %v554_v31 = vshll.u32 %v2289_v26, 16  ;;  %v561_v38 = vrot.slane %v559_v32, 1  ;;  %v1343_v39 = vshll.u32 %v3009_v34, 16  ;;  %v687_v58 = vld [vmem:[%s2997_s8] sm:$0xe] }
  0x3e   : > { %v1347_v40 = vshrl.u32 %v3009_v34, 16  ;;  %v1336_v41 = vshrl.u32 %v2342_v35, 16  ;;  %v1338_v42 = vshll.u32 %v2342_v35, 16  ;;  %v567_v43 = vshll.u32 %v3012_v36, 16  ;;  %v2300_v8 = vld [vmem:[%s3294_s3 + $0xc] sm:$0xf] }
  0x3f   : > { %v556_v37 = vrot.slane %v554_v31, 1  ;;  %v3019_v44 = vld [vmem:[%s2997_s8 + $0x24] ss:$0 sps:$4 sm:$0x11]   ;;  %v565_v46 = vor.u32 %v563_v33, %v561_v38  ;;  %v1345_v47 = vrot.slane %v1343_v39, 1  ;;  %v2297_v63 = vcombine.low %v687_v58, %v530_v25  ;;  %s3067_s23 = scalar_lea.vmem [#allocation4], %s2678_s18 }
  0x40   : > { %v1340_v48 = vrot.slane %v1338_v42, 1  ;;  %v569_v49 = vrot.slane %v567_v43, 1  ;;  %v1351_v50 = vshll.u32 %v3019_v44, 16  ;;  %v2351_v1 = vcombine.low %v2349_v0, %v2337_v29  ;;  %v2358_v11 = vld [vmem:[%s3294_s3 + $0xc] sm:$0xf]  ;;  %v3080_v18 = vld [vmem:[%s3032_s13 + $0x8] sm:$0xff]  }
  0x41   : > { %v557_v45 = vor.u32 %v556_v37, %v552_v30  ;;  %v1349_v52 = vor.u32 %v1347_v40, %v1345_v47  ;;  %v694_v2 = vrot.slane %v2297_v63, 1  ;;  %v695_v3 = vrot.slane %v3002_v27, 1  ;;  %v839_v12 = vld [vmem:[%s3032_s13] sm:$0xf]  ;;  %v3065_v13 = vld [vmem:[%s3032_s13 + $0x4] sm:$0xf] }
  0x42   : > { %v1341_v54 = vor.u32 %v1340_v48, %v1336_v41  ;;  %v570_v55 = vsel %vm550_vm1, %v565_v46, %v569_v49  ;;  %v1353_v56 = vrot.slane %v1351_v50, 1  ;;  %v1474_v4 = vrot.slane %v2351_v1, 1  ;;  %v2363_v14 = vld [vmem:[%s3032_s13 + $0x14] sm:$0xf]  ;;  %v3074_v15 = vld [vmem:[%s3032_s13 + $0x18] sm:$0xf] }
  0x43   : > { %v562_v51 = vsel %vm550_vm1, %v557_v45, %v561_v38  ;;  %v1475_v5 = vrot.slane %v3009_v34, 1  ;;  %v696_v7 = vsel %vm693_vm3, %v694_v2, %v695_v3  ;;  %v1486_v9 = vsel %vm578_vm0, %v2350_v62, 0  ;;  %v2743_v22 = vld [vmem:[%s3032_s13] sm:$0xff]   ;;  %v2762_v29 = vld [vmem:[%s3067_s23 + $0x1c] sm:$0xff]   ;;  %v2744_v31 = vld [vmem:[%s3032_s13 + $0x14] sm:$0xff]   ;;  %s2287_s12 = sshll.u32 %s476_s15, 5 }
  0x44   : > { %2484 = vmatprep.mubr.msk.bf16.mxu0 %vm571_vm2, %v562_v51  ;;  %v1346_v60 = vsel %vm550_vm1, %v1341_v54, %v1345_v47  ;;  %v1354_v61 = vsel %vm550_vm1, %v1349_v52, %v1353_v56  ;;  %v697_v16 = vrot.slane %v3012_v36, 1  ;;  %v2306_v17 = vcombine.low %v839_v12, %v3065_v13  ;;  %v2305_v25 = vld [vmem:[%s3294_s3 + $0x10] sm:$0xf]  ;;  %v2764_v42 = vld [vmem:[%s3067_s23 + $0x24] ss:$0 sps:$4 sm:$0x11]  }
  0x45   : > { %2485 = vmatmul.mubr.msk.bf16.vlgmr.msra.gmra.mrb[0].mxu0 %vm571_vm2, %v570_v55  ;;  %2538 = vmatprep.mubr.msk.bf16.mxu1 %vm571_vm2, %v1346_v60  ;;  %v1476_v10 = vsel %vm693_vm3, %v1474_v4, %v1475_v5  ;;  %v2369_v19 = vcombine.low %v2363_v14, %v3074_v15  ;;  %v1477_v20 = vrot.slane %v3019_v44, 1  ;;  %v784_v24 = vsel %vm578_vm0, %v2300_v8, 0  ;;  %v2368_v33 = vld [vmem:[%s3294_s3 + $0x10] sm:$0xf]  ;;  %v1194_v45 = vld [vmem:[%s3067_s23] sm:$0xe] }
  0x46   : > { %2489 = vmatpush3.bf16.msra.mxu0 %v636_v53  ;;  %2490 = vmatprep.mubr.msk.bf16.mxu0 %vm571_vm2, %v2289_v26  ;;  %v698_v21 = vsel %vm693_vm3, %v695_v3, %v697_v16  ;;  %v862_v23 = vshll.u32 %v2306_v17, 16  ;;  %v867_v26 = vshll.u32 %v3080_v18, 16  ;;  %v1564_v32 = vsel %vm578_vm0, %v2358_v11, 0  ;;  %v3109_v43 = vld [vmem:[%s3067_s23 + $0x8] sm:$0xff]   ;;  %v2399_v46 = vld [vmem:[%s3067_s23 + $0x14] sm:$0xe] }
  0x47   : > { %2656 = vmatprep.subr.msk.bf16.mxu0 %vm578_vm0, %v2296_v57  ;;  %2539 = vmatmul.mubr.msk.bf16.vlgmr.msra.gmra.mrb[0].mxu1 %vm571_vm2, %v1354_v61  ;;  %v1641_v28 = vshll.u32 %v2369_v19, 16  ;;  %v1478_v30 = vsel %vm693_vm3, %v1475_v5, %v1477_v20  ;;  %v1897_v37 = vshll.u32 %v2762_v29, 16  ;;  %v1901_v38 = vshrl.u32 %v2762_v29, 16  ;;  %v3117_v48 = vld [vmem:[%s3067_s23 + $0x4] sm:$0xf]  ;;  %v2745_v58 = vld [vmem:[%s3032_s13 + $0x8] sm:$0xff]  }
  0x48   : > { %2543 = vmatpush3.bf16.msra.mxu1 %v1418_v59  ;;  %2544 = vmatprep.mubr.msk.bf16.mxu1 %vm571_vm2, %v2342_v35  ;;  %v864_v35 = vrot.slane %v862_v23, 1  ;;  %v869_v36 = vrot.slane %v867_v26, 1  ;;  %v1639_v39 = vshrl.u32 %v2369_v19, 16  ;;  %v3120_v49 = vld [vmem:[%s3067_s23 + $0x18] sm:$0xf]  ;;  %v1905_v50 = vshll.u32 %v2764_v42, 16 }
  0x49   : > { %2665 = vmatprep.subr.msk.bf16.mxu1 %vm578_vm0, %v2350_v62  ;;  %v1643_v40 = vrot.slane %v1641_v28, 1  ;;  %v3111_v44 = vrot.slane %v1897_v37, 1  ;;  %v1977_v51 = vrot.slane %v2762_v29, 1  ;;  %v2327_v53 = vcombine.low %v1194_v45, %v3117_v48  ;;  %v2751_v63 = vld [vmem:[%s3032_s13 + $0x10] ss:$0 sps:$4 sm:$0x11]  }
  0x4a   : > { %v1201_v54 = vrot.slane %v3109_v43, 1  ;;  %v2401_v55 = vcombine.low %v2399_v46, %v3120_v49  ;;  %v1907_v56 = vrot.slane %v1905_v50, 1  ;;  %v1979_v57 = vrot.slane %v2764_v42, 1  ;;  %v2375_v16 = vld [vmem:[%s3294_s3 + $0x14] sm:$0xf]  ;;  %v2755_v42 = vld [vmem:[%s3067_s23] sm:$0xff]  }
  0x4b   : > { %v1903_v52 = vor.u32 %v1901_v38, %v3111_v44  ;;  %v1200_v59 = vrot.slane %v2327_v53, 1  ;;  %v1644_v61 = vor.u32 %v1643_v40, %v1639_v39  ;;  %v886_v2 = vsel %vm578_vm0, %v2305_v25, 0  ;;  %v2374_v19 = vld [vmem:[%s3032_s13 + $0x14] sm:$0xe]  ;;  %v2388_v39 = vld [vmem:[%s3067_s23 + $0x14] sm:$0xf] }
  0x4c   : > { %v1976_v60 = vrot.slane %v2401_v55, 1  ;;  %v3132_v1 = vsel %vm693_vm3, %v1977_v51, %v1979_v57  ;;  %v875_v14 = vshll.u32 %v2751_v63, 16  ;;  %v948_v26 = vrot.slane %v3080_v18, 1  ;;  %v2320_v50 = vld [vmem:[%s3294_s3 + $0x1c] sm:$0xf]  ;;  %s525_s25 = scalar_lea.vmem [#allocation5], %s2287_s12 }
  0x4d   : > { %v3129_v0 = vsel %vm550_vm1, %v1903_v52, %v1907_v56  ;;  %v3139_v4 = vsel %vm693_vm3, %v1200_v59, %v1201_v54  ;;  %v950_v37 = vrot.slane %v2751_v63, 1  ;;  %v2394_v45 = vcombine.low %v2388_v39, %v3120_v49  ;;  %v2756_v52 = vld [vmem:[%s3067_s23 + $0x14] sm:$0xff]   ;;  %s2427_s15 = sshll.u32 (%p2948_p11), %s2261_s28, 4 }
  0x4e   : > { %v3142_v5 = vsel %vm693_vm3, %v1976_v60, %v1977_v51  ;;  %v877_v23 = vrot.slane %v875_v14, 1  ;;  %v2393_v49 = vld [vmem:[%s3294_s3 + $0x1c] sm:$0xf]  ;;  %v1120_v57 = vshll.u32 %v3109_v43, 16  ;;  %v2400_v14 = vld [vmem:[%s3294_s3 + $0x20] sm:$0xf]  ;;  %s2099_s10 = scalar_lea.vmem (%p2948_p11), %s3297_s6, %s2427_s15 }
  0x4f   : > { %v1892_v53 = vshll.u32 %v2394_v45, 16  ;;  %vm1309_vm4 = vcmask 60416  }
  0x51   : > { %2491 = vmatmul.mubr.msk.bf16.vlgmr.msra.gmra.mrb[0].mxu0 %vm571_vm2, %v3002_v27  ;;  %v3092_v27 = vld [vmem:[%s3032_s13 + $0x1c] sm:$0xff]   ;;  %v1894_v59 = vrot.slane %v1892_v53, 1 }
  0x52   : > { %2495 = vmatpush3.bf16.msra.mxu0 %v706_v6  ;;  %2496 = vmatprep.mubr.msk.bf16.mxu0 %vm571_vm2, %v696_v7  ;;  %v1646_v41 = vshll.u32 %v3092_v27, 16  ;;  %v2746_v6 = vld [vmem:[%s3032_s13 + $0x1c] sm:$0xff]   ;;  %v1650_v20 = vshrl.u32 %v3092_v27, 16 }
  0x53   : > { %2657 = vmatprep.subr.msk.bf16.mxu0 %vm578_vm0, %v2300_v8  ;;  %2545 = vmatmul.mubr.msk.bf16.vlgmr.msra.gmra.mrb[0].mxu1 %vm571_vm2, %v3009_v34  ;;  %v860_v34 = vshrl.u32 %v2306_v17, 16  ;;  %v2311_v7 = vld [vmem:[%s3294_s3 + $0x14] sm:$0xf]  ;;  %v941_v8 = vld [vmem:[%s3032_s13] sm:$0xe] }
  0x54   : > { %2549 = vmatpush3.bf16.msra.mxu1 %v1486_v9  ;;  %2550 = vmatprep.mubr.msk.bf16.mxu1 %vm571_vm2, %v1476_v10  ;;  %v1648_v62 = vrot.slane %v1646_v41, 1  ;;  %v2752_v9 = vld [vmem:[%s3032_s13 + $0x24] ss:$0 sps:$4 sm:$0x11]   ;;  %v1665_v10 = vsel %vm578_vm0, %v2368_v33, 0  ;;  %v2312_v17 = vcombine.low %v941_v8, %v3065_v13  ;;  %v951_v41 = vsel %vm693_vm3, %v948_v26, %v950_v37 }
  0x55   : > { %2666 = vmatprep.subr.msk.bf16.mxu1 %vm578_vm0, %v2358_v11  ;;  %v865_v47 = vor.u32 %v864_v35, %v860_v34  ;;  %v871_v11 = vshrl.u32 %v3080_v18, 16  ;;  %v2315_v34 = vld [vmem:[%s3294_s3 + $0x18] sm:$0xf]  ;;  %v1737_v18 = vsel %vm578_vm0, %v2375_v16, 0  ;;  %v1728_v40 = vrot.slane %v2752_v9, 1 }
  0x56   : > { %v1649_v12 = vsel %vm550_vm1, %v1644_v61, %v1648_v62  ;;  %v1652_v28 = vor.u32 %v1650_v20, %v1648_v62  ;;  %v2383_v35 = vld [vmem:[%s3294_s3 + $0x18] sm:$0xf]  ;;  %v1037_v46 = vsel %vm578_vm0, %v2315_v34, 0  ;;  %v1122_v61 = vrot.slane %v1120_v57, 1  ;;  %v2757_v62 = vld [vmem:[%s3067_s23 + $0x8] sm:$0xff]  }
  0x57   : > { %v870_v3 = vsel %vm550_vm1, %v865_v47, %v869_v36  ;;  %v2326_v8 = vld [vmem:[%s3294_s3 + $0x20] sm:$0xf]  ;;  %v1988_v20 = vsel %vm578_vm0, %v2400_v14, 0 }
  0x5d   : > { %2497 = vmatmul.mubr.msk.bf16.vlgmr.msra.gmra.mrb[0].mxu0 %vm571_vm2, %v698_v21  ;;  %v1654_v21 = vshll.u32 %v2752_v9, 16  ;;  %v1916_v9 = vsel %vm578_vm0, %v2393_v49, 0 }
  0x5e   : > { %2501 = vmatpush3.bf16.msra.mxu0 %v784_v24  ;;  %2502 = vmatprep.mubr.msk.bf16.mxu0 %vm571_vm2, %v2743_v22  ;;  %v873_v22 = vor.u32 %v871_v11, %v869_v36  ;;  %v2376_v24 = vcombine.low %v2374_v19, %v3074_v15  ;;  %v1092_v36 = vld [vmem:[%s3067_s23] sm:$0xf] }
  0x5f   : > { %2658 = vmatprep.subr.msk.bf16.mxu0 %vm578_vm0, %v2305_v25  ;;  %2551 = vmatmul.mubr.msk.bf16.vlgmr.msra.gmra.mrb[0].mxu1 %vm571_vm2, %v1478_v30  ;;  %v947_v25 = vrot.slane %v2312_v17, 1  ;;  %v1656_v13 = vrot.slane %v1654_v21, 1  ;;  %v2321_v38 = vcombine.low %v1092_v36, %v3117_v48  ;;  %v1815_v48 = vsel %vm578_vm0, %v2383_v35, 0 }
  0x60   : > { %2555 = vmatpush3.bf16.msra.mxu1 %v1564_v32  ;;  %2556 = vmatprep.mubr.msk.bf16.mxu1 %vm571_vm2, %v2744_v31  ;;  %v878_v29 = vsel %vm550_vm1, %v873_v22, %v877_v23  ;;  %v1725_v30 = vrot.slane %v2376_v24, 1  ;;  %v1726_v31 = vrot.slane %v3092_v27, 1  ;;  %v959_v32 = vsel %vm578_vm0, %v2311_v7, 0 }
  0x61   : > { %2667 = vmatprep.subr.msk.bf16.mxu1 %vm578_vm0, %v2368_v33  ;;  %v949_v33 = vsel %vm693_vm3, %v947_v25, %v948_v26  ;;  %v1657_v15 = vsel %vm550_vm1, %v1652_v28, %v1656_v13  ;;  %v1115_v47 = vshll.u32 %v2321_v38, 16  ;;  %v1113_v55 = vshrl.u32 %v2321_v38, 16 }
  0x62   : > { %v1727_v27 = vsel %vm693_vm3, %v1725_v30, %v1726_v31  ;;  %v1729_v51 = vsel %vm693_vm3, %v1726_v31, %v1728_v40 }
  0x63   : > { %v1117_v56 = vrot.slane %v1115_v47, 1 }
  0x65   : > { %v1118_v60 = vor.u32 %v1117_v56, %v1113_v55 }
  0x69   : > { %2503 = vmatmul.mubr.msk.bf16.vlgmr.msra.gmra.mrb[0].mxu0 %vm571_vm2, %v2745_v58  ;;  %v1890_v58 = vshrl.u32 %v2394_v45, 16 }
  0x6a   : > { %2507 = vmatpush3.bf16.msra.mxu0 %v886_v2  ;;  %2508 = vmatprep.mubr.msk.bf16.mxu0 %vm571_vm2, %v870_v3  ;;  %v2763_v2 = vld [vmem:[%s3067_s23 + $0x10] ss:$0 sps:$4 sm:$0x11]   ;;  %v1139_v3 = vsel %vm578_vm0, %v2320_v50, 0 }
  0x6b   : > { %2659 = vmatprep.subr.msk.bf16.mxu0 %vm578_vm0, %v2311_v7  ;;  %2557 = vmatmul.mubr.msk.bf16.vlgmr.msra.gmra.mrb[0].mxu1 %vm571_vm2, %v2746_v6  ;;  %v1895_v63 = vor.u32 %v1894_v59, %v1890_v58  ;;  %v1123_v6 = vsel %vm550_vm1, %v1118_v60, %v1122_v61  ;;  %v2758_v7 = vld [vmem:[%s3067_s23 + $0x1c] sm:$0xff]   ;;  %v1203_v21 = vrot.slane %v2763_v2, 1 }
  0x6c   : > { %2561 = vmatpush3.bf16.msra.mxu1 %v1665_v10  ;;  %2562 = vmatprep.mubr.msk.bf16.mxu1 %vm571_vm2, %v1649_v12  ;;  %v1124_v10 = vshrl.u32 %v3109_v43, 16  ;;  %v1128_v12 = vshll.u32 %v2763_v2, 16 }
  0x6d   : > { %2668 = vmatprep.subr.msk.bf16.mxu1 %vm578_vm0, %v2375_v16  ;;  %v1900_v11 = vsel %vm550_vm1, %v1895_v63, %v3111_v44  ;;  %v1212_v44 = vsel %vm578_vm0, %v2326_v8, 0  ;;  %v1204_v22 = vsel %vm693_vm3, %v1201_v54, %v1203_v21 }
  0x6e   : > { %v1126_v16 = vor.u32 %v1124_v10, %v1122_v61  ;;  %v1130_v17 = vrot.slane %v1128_v12, 1 }
  0x70   : > { %v1131_v19 = vsel %vm550_vm1, %v1126_v16, %v1130_v17 }
  0x75   : > { %2509 = vmatmul.mubr.msk.bf16.vlgmr.msra.gmra.mrb[0].mxu0 %vm571_vm2, %v878_v29 }
  0x76   : > { %2513 = vmatpush3.bf16.msra.mxu0 %v959_v32  ;;  %2514 = vmatprep.mubr.msk.bf16.mxu0 %vm571_vm2, %v949_v33 }
  0x77   : > { %2660 = vmatprep.subr.msk.bf16.mxu0 %vm578_vm0, %v2315_v34  ;;  %2563 = vmatmul.mubr.msk.bf16.vlgmr.msra.gmra.mrb[0].mxu1 %vm571_vm2, %v1657_v15 }
  0x78   : > { %2567 = vmatpush3.bf16.msra.mxu1 %v1737_v18  ;;  %2568 = vmatprep.mubr.msk.bf16.mxu1 %vm571_vm2, %v1727_v27 }
  0x79   : > { %2669 = vmatprep.subr.msk.bf16.mxu1 %vm578_vm0, %v2383_v35 }
  0x81   : > { %2515 = vmatmul.mubr.msk.bf16.vlgmr.msra.gmra.mrb[0].mxu0 %vm571_vm2, %v951_v41 }
  0x82   : > { %2519 = vmatpush3.bf16.msra.mxu0 %v1037_v46  ;;  %2520 = vmatprep.mubr.msk.bf16.mxu0 %vm571_vm2, %v2755_v42 }
  0x83   : > { %2661 = vmatprep.subr.msk.bf16.mxu0 %vm578_vm0, %v2320_v50  ;;  %2569 = vmatmul.mubr.msk.bf16.vlgmr.msra.gmra.mrb[0].mxu1 %vm571_vm2, %v1729_v51 }
  0x84   : > { %2573 = vmatpush3.bf16.msra.mxu1 %v1815_v48  ;;  %2574 = vmatprep.mubr.msk.bf16.mxu1 %vm571_vm2, %v2756_v52 }
  0x85   : > { %2670 = vmatprep.subr.msk.bf16.mxu1 %vm578_vm0, %v2393_v49 }
  0x8d   : > { %2521 = vmatmul.mubr.msk.bf16.vlgmr.msra.gmra.mrb[0].mxu0 %vm571_vm2, %v2757_v62 }
  0x8e   : > { %2525 = vmatpush3.bf16.msra.mxu0 %v1139_v3  ;;  %2526 = vmatprep.mubr.msk.bf16.mxu0 %vm571_vm2, %v1123_v6 }
  0x8f   : > { %2662 = vmatprep.subr.msk.bf16.mxu0 %vm578_vm0, %v2326_v8  ;;  %2575 = vmatmul.mubr.msk.bf16.vlgmr.msra.gmra.mrb[0].mxu1 %vm571_vm2, %v2758_v7 }
  0x90   : > { %2579 = vmatpush3.bf16.msra.mxu1 %v1916_v9  ;;  %2580 = vmatprep.mubr.msk.bf16.mxu1 %vm571_vm2, %v1900_v11 }
  0x91   : > { %2671 = vmatprep.subr.msk.bf16.mxu1 %vm578_vm0, %v2400_v14 }
  0x99   : > { %2527 = vmatmul.mubr.msk.bf16.vlgmr.msra.gmra.mrb[0].mxu0 %vm571_vm2, %v1131_v19 }
  0x9a   : > { %2531 = vmatpush3.bf16.msra.mxu0 %v1212_v44  ;;  %2532 = vmatprep.mubr.msk.bf16.mxu0 %vm571_vm2, %v3139_v4  ;;  %v2330_v4 = vld [vmem:[%s3295_s4] ss:$0 sm:$0xff] }
  0x9b   : > { %2581 = vmatmul.mubr.msk.bf16.vlgmr.msra.gmra.mrb[0].mxu1 %vm571_vm2, %v3129_v0  ;;  %v2331_v0 = vld [vmem:[%s3296_s5] ss:$0 sm:$0xff] }
  0x9c   : > { %2585 = vmatpush3.bf16.msra.mxu1 %v1988_v20  ;;  %2586 = vmatprep.mubr.msk.bf16.mxu1 %vm571_vm2, %v3142_v5 }
  0xa5   : > { %2533 = vmatmul.mubr.msk.bf16.vlgmr.msra.gmra.mrb[0].mxu0 %vm571_vm2, %v1204_v22 }
  0xa7   : > { %2587 = vmatmul.mubr.msk.bf16.vlgmr.msra.gmra.mrb[0].mxu1 %vm571_vm2, %v3132_v1 }
 0x178   : > { %v2534_v23 = vpop.f32.mrb[0].mxu0 }
 0x179   : > { %v1276_v5 = vmul.f32 %v2534_v23, %v2330_v4  ;;  %v1248_v24 = vpop.f32.mrb[1].mxu0 }
 0x17a   : > { %v1274_v25 = vmul.f32 %v2330_v4, %v1248_v24  ;;  %v2535_v43 = vpop.f32.mrb[2].mxu0  ;;  %v2588_v26 = vpop.f32.mrb[0].mxu1 }
 0x17b   : > { %v1287_v54 = vadd.f32 %v2331_v0, %v1276_v5  ;;  %v1277_v28 = vmul.f32 %v2535_v43, %v2330_v4  ;;  %v1251_v13 = vpop.f32.mrb[3].mxu0  ;;  %v2052_v1 = vmul.f32 %v2588_v26, %v2330_v4  ;;  %v2024_v30 = vpop.f32.mrb[1].mxu1 }
 0x17c   : > { %v1285_v29 = vadd.f32 %v2331_v0, %v1274_v25  ;;  %v1275_v31 = vmul.f32 %v2330_v4, %v1251_v13  ;;  %v2050_v33 = vmul.f32 %v2330_v4, %v2024_v30  ;;  %v2589_v15 = vpop.f32.mrb[2].mxu1 }
 0x17d   : > { %v1291_v32 = vmax.f32 %v1287_v54, 0.0  ;;  %v1288_v34 = vadd.f32 %v2331_v0, %v1277_v28  ;;  %v2063_v18 = vadd.f32 %v2331_v0, %v2052_v1  ;;  %v2053_v35 = vmul.f32 %v2589_v15, %v2330_v4  ;;  %v2027_v37 = vpop.f32.mrb[3].mxu1 }
 0x17e   : > { %v1289_v27 = vmax.f32 %v1285_v29, 0.0  ;;  %v1286_v36 = vadd.f32 %v2331_v0, %v1275_v31  ;;  %v2061_v39 = vadd.f32 %v2331_v0, %v2050_v33  ;;  %v2051_v41 = vmul.f32 %v2330_v4, %v2027_v37 }
 0x17f   : > { %v2421_v38 = vpack.c.bf16 %v1291_v32, %v1291_v32  ;;  %v1292_v40 = vmax.f32 %v1288_v34, 0.0  ;;  %v2067_v42 = vmax.f32 %v2063_v18, 0.0  ;;  %v2064_v46 = vadd.f32 %v2331_v0, %v2053_v35 }
 0x180   : > { %v2419_v45 = vpack.c.bf16 %v1289_v27, %v1289_v27  ;;  %v1290_v47 = vmax.f32 %v1286_v36, 0.0  ;;  %v2065_v50 = vmax.f32 %v2061_v39, 0.0  ;;  %v2062_v52 = vadd.f32 %v2331_v0, %v2051_v41  ;;  %2096 = sbr.rel (!%p2948_p11) target bundleno = 399 (0x18f), region = 171 }
 0x181   : > { %1312 = vst.msk [vmem:[%s525_s25 + $0x8] sm:$0xf] %vm1309_vm4, %v2421_v38  ;;  %v2422_v51 = vpack.c.bf16 %v1292_v40, %v1292_v40  ;;  %v2425_v48 = vpack.c.bf16 %v2067_v42, %v2067_v42  ;;  %v2068_v53 = vmax.f32 %v2064_v46, 0.0 }
 0x182   : > { %1310 = vst.msk [vmem:[%s525_s25] sm:$0xf] %vm1309_vm4, %v2419_v45  ;;  %v2420_v49 = vpack.c.bf16 %v1290_v47, %v1290_v47  ;;  %v2423_v55 = vpack.c.bf16 %v2065_v50, %v2065_v50  ;;  %v2066_v56 = vmax.f32 %v2062_v52, 0.0 }
 0x183   : > { %1313 = vst.msk [vmem:[%s525_s25 + $0xc] sm:$0xf] %vm1309_vm4, %v2422_v51  ;;  %2412 = vst.msk [vmem:[%s525_s25 + $0x18] sm:$0xf] %vm1309_vm4, %v2425_v48  ;;  %v2426_v57 = vpack.c.bf16 %v2068_v53, %v2068_v53 }
 0x184   : > { %1311 = vst.msk [vmem:[%s525_s25 + $0x4] sm:$0xf] %vm1309_vm4, %v2420_v49  ;;  %2410 = vst.msk [vmem:[%s525_s25 + $0x10] sm:$0xf] %vm1309_vm4, %v2423_v55  ;;  %v2424_v58 = vpack.c.bf16 %v2066_v56, %v2066_v56 }
 0x185   : > { %2413 = vst.msk [vmem:[%s525_s25 + $0x1c] sm:$0xf] %vm1309_vm4, %v2426_v57 }
 0x186   : > { %2411 = vst.msk [vmem:[%s525_s25 + $0x14] sm:$0xf] %vm1309_vm4, %v2424_v58 }
 0x18a   : > { %v2119_v60 = vld [vmem:[%s525_s25 + $0x8] sm:$0xff]  }
 0x18b   : > { %v2115_v59 = vld [vmem:[%s525_s25] sm:$0xff]   ;;  %2120 = vst [vmem:[%s2099_s10 + $0x8] sm:$0xff] %v2119_v60  }
 0x18c   : > { %v2127_v62 = vld [vmem:[%s525_s25 + $0x18] sm:$0xff]   ;;  %2116 = vst [vmem:[%s2099_s10] sm:$0xff] %v2115_v59  }
 0x18d   : > { %v2123_v61 = vld [vmem:[%s525_s25 + $0x10] sm:$0xff]   ;;  %2128 = vst [vmem:[%s2099_s10 + $0x108] sm:$0xff] %v2127_v62  }
 0x18e   : > { %2124 = vst [vmem:[%s2099_s10 + $0x100] sm:$0xff] %v2123_v61  }
 0x18f PF: > { %p13_p2 = scmp.ge.s32.totalorder %s2895_s29, 18   ;;  %s3302_s21 = smov %s2801_s22 }
 0x190   : > { %s3303_s22 = smov %s2937_s19  ;;  %s3304_s23 = smov %s2809_s24 }
 0x191   : > { %s3305_s24 = smov %s2922_s14  ;;  %s3306_s25 = smov %s2817_s26 }
 0x192   : > { %s3307_s26 = smov %s2905_s9  ;;  %s3308_s27 = smov %s2895_s29 }
 0x193   :  { %15 = sbr.rel (!%p13_p2) target bundleno = 4 (0x4), region = 271 }

</bundles_post_ra>
